<compile_context>
chip_gen: v6e
topology: v6e:2x2x1
jax: 0.10.0
libtpu: 0.0.40
codegen_flags: <defaults>
</compile_context>

<pallas_src>
import functools

import jax
import jax.numpy as jnp
import numpy as np
from jax import lax
from jax.experimental import pallas as pl
from jax.experimental.pallas import tpu as pltpu

# ~2M predict elements per grid step, TOTAL across classes (8 MiB for f32).
_TARGET_BLOCK_ELEMS = 2 * 1024 * 1024
# Stay well under v7x's 64 MiB physical VMEM (predict 2x8 MiB + target + temps).
_VMEM_LIMIT_BYTES = 48 * 1024 * 1024


def _dice_partial_kernel(p_pow, num_cls, needs_row_mask, s_rows, row_tile,
                         pred_ref, tgt_ref, out_ref):
    """pred_ref: [C, row_tile, lane_w] (native float dtype),
    tgt_ref:  [row_tile, lane_w] (native int dtype),
    out_ref:  [8, 128] f32 per-(sample, spatial-tile) partial sums
              (lane 0 = sum(pred*onehot), lane 1 = sum(pred**p))."""
    tgt = tgt_ref[...]                              # native int dtype, loaded once
    lane_w = tgt.shape[-1]

    if needs_row_mask:
        # cdiv grid: the last spatial tile reads past s_rows; zero its contribution.
        ji = pl.program_id(1)
        row_idx = lax.broadcasted_iota(jnp.int32, (row_tile, lane_w), 0)
        valid = row_idx < (s_rows - ji * row_tile)

    num = jnp.float32(0.0)
    den = jnp.float32(0.0)
    for ci in range(num_cls):                       # static loop, C is small
        pred_c = pred_ref[ci].astype(jnp.float32)   # [row_tile, lane_w]
        if needs_row_mask:
            pred_c = jnp.where(valid, pred_c, 0.0)
        # Compare in the target's native dtype (cast the scalar, not the tile);
        # onehot is never materialised as floats.
        match = tgt == jnp.asarray(ci, dtype=tgt.dtype)
        num = num + jnp.sum(jnp.where(match, pred_c, 0.0))
        pred_p = pred_c if p_pow == 1 else pred_c ** p_pow
        den = den + jnp.sum(pred_p)                 # sum(onehot**p) added as a
                                                    # compile-time constant outside

    lane = lax.broadcasted_iota(jnp.int32, (8, 128), 1)
    out_ref[...] = jnp.where(lane == 0, num,
                             jnp.where(lane == 1, den, jnp.float32(0.0)))


def _pick_lane_width(s):
    """s is a multiple of 128; prefer wider lanes while keeping >= 8 sublane rows."""
    for lw in (1024, 512, 256, 128):
        if s % lw == 0 and s // lw >= 8:
            return lw
    for lw in (1024, 512, 256, 128):
        if s % lw == 0:
            return lw
    raise ValueError("spatial size must be a multiple of 128 at this point")


def _pick_row_tile(s_rows, max_rows):
    """Returns (row_tile, n_row_tiles, needs_row_mask)."""
    if s_rows <= max_rows:
        return s_rows, 1, False                     # one full block over rows
    # Prefer divisors that are multiples of 32 (int8 (32,128) / bf16 (16,128)
    # native tiles), then multiples of 8.
    for step in (32, 8):
        best = 0
        for cand in range(step, max_rows + 1, step):
            if s_rows % cand == 0:
                best = cand
        if best:
            return best, s_rows // best, False
    # No suitable divisor: cdiv grid + in-kernel mask on the last tile
    # (never emit a single shape-dependent giant block).
    rt = max(32, (max_rows // 32) * 32)
    return rt, -(-s_rows // rt), True


def dice_loss(predict, target, *, smooth=1e-6, p=1, reduction="mean", num_classes=2):
    """Pallas TPU DiceLoss. predict: [N, C, *spatial] float, target: [N, *spatial] int."""
    assert predict.shape[0] == target.shape[0], "predict & target batch size don't match"
    n = predict.shape[0]
    c = num_classes
    assert predict.shape[1] == c, "predict channel dim must equal num_classes"
    s_orig = int(np.prod(predict.shape[2:])) if predict.ndim > 2 else 1
    assert int(np.prod(target.shape[1:])) == s_orig, "spatial sizes must match"

    pred_flat = predict.reshape(n, c, s_orig)       # contiguous reshapes only
    tgt_flat = target.reshape(n, s_orig)

    # sum(onehot**p) is a compile-time constant: every voxel has exactly one 1
    # across classes (F.one_hot / scatter_ contract: targets in [0, num_classes)),
    # so the one-hot never needs to be built or summed on device.  Uses the
    # UNPADDED voxel count, valid for p >= 1.
    onehot_den = float(n) * float(s_orig)

    s = s_orig
    if s % 128 != 0:
        # Rare ragged-lane case: pad the spatial axis to a multiple of 128.  Padded
        # predict is 0 (contributes nothing to num/den for p >= 1) and padded target
        # matches no class.  Row raggedness (below) is masked in-kernel with no copy.
        # TODO(synk): a zero-copy ragged lane tail would need a manual-DMA gather path.
        pad = (-s) % 128
        tdt = np.dtype(target.dtype)
        pad_val = -1 if np.issubdtype(tdt, np.signedinteger) else np.iinfo(tdt).max
        pred_flat = jnp.pad(pred_flat, ((0, 0), (0, 0), (0, pad)))
        tgt_flat = jnp.pad(tgt_flat, ((0, 0), (0, pad)), constant_values=pad_val)
        s = s + pad

    lane_w = _pick_lane_width(s)
    s_rows = s // lane_w
    per_class_elems = max(1, _TARGET_BLOCK_ELEMS // c)   # keep total block ~constant
    max_rows = max(32, per_class_elems // lane_w)
    row_tile, n_row_tiles, needs_mask = _pick_row_tile(s_rows, max_rows)

    pred3 = pred_flat.reshape(n * c, s_rows, lane_w)   # class-major slab, no transpose
    tgt3 = tgt_flat.reshape(n, s_rows, lane_w)         # native int dtype

    kernel = functools.partial(_dice_partial_kernel, int(p), c, needs_mask,
                               s_rows, row_tile)
    partials = pl.pallas_call(
        kernel,
        out_shape=jax.ShapeDtypeStruct((n, n_row_tiles, 8, 128), jnp.float32),
        grid_spec=pltpu.PrefetchScalarGridSpec(
            num_scalar_prefetch=0,
            grid=(n, n_row_tiles),
            in_specs=[
                # all C classes of sample ni for one spatial row-tile in one block
                pl.BlockSpec((c, row_tile, lane_w), lambda ni, ji: (ni, ji, 0)),
                # target tile read exactly once per (sample, spatial-tile)
                pl.BlockSpec((None, row_tile, lane_w), lambda ni, ji: (ni, ji, 0)),
            ],
            # per-tile lane-dense partials -> no cross-step carry, both axes parallel
            out_specs=pl.BlockSpec((None, None, 8, 128), lambda ni, ji: (ni, ji, 0, 0)),
        ),
        compiler_params=pltpu.CompilerParams(
            dimension_semantics=("parallel", "parallel"),
            vmem_limit_bytes=_VMEM_LIMIT_BYTES,
        ),
    )(pred3, tgt3)

    # Tiny tree-summed epilogue in plain JAX.
    num = 2.0 * jnp.sum(partials[:, :, 0, 0]) + jnp.float32(smooth)
    den = jnp.sum(partials[:, :, 0, 1]) + jnp.float32(onehot_den) + jnp.float32(smooth)
    loss = 1.0 - num / den
    if reduction in ("mean", "sum", "none"):
        # num/den are global sums, so loss is a 0-d scalar and all reductions
        # coincide -- exactly the PyTorch module's behaviour.
        return loss
    raise Exception("Unexpected reduction {}".format(reduction))


def _dice_loss_reference(predict, target, *, smooth=1e-6, p=1, num_classes=2):
    """Pure-JAX mirror of the PyTorch forward, for validation."""
    n = predict.shape[0]
    pred = predict.reshape(n, -1).astype(jnp.float32)
    onehot = jax.nn.one_hot(target, num_classes, axis=1, dtype=jnp.float32)
    tgt = onehot.reshape(n, -1)
    num = jnp.sum(pred * tgt) * 2 + smooth
    den = jnp.sum(pred ** p + tgt ** p) + smooth
    return 1 - num / den


if __name__ == "__main__":
    key = jax.random.PRNGKey(0)
    kp, kt = jax.random.split(key)

    N, C, D1, D2, D3 = 2, 2, 8, 16, 16   # num_classes=2 per the module default
    predict = jax.random.uniform(kp, (N, C, D1, D2, D3), dtype=jnp.float32)
    # Kernel accepts any integer target dtype and compares it natively (int8 works
    # too and minimises HBM bytes); int32 used here as the most common label dtype.
    target = jax.random.randint(kt, (N, D1, D2, D3), 0, C, dtype=jnp.int32)

    loss = dice_loss(predict, target, smooth=1e-6, p=1, reduction="mean", num_classes=C)
    loss = jax.block_until_ready(loss)

    ref = _dice_loss_reference(predict, target, smooth=1e-6, p=1, num_classes=C)
    ref = jax.block_until_ready(ref)

    np.testing.assert_allclose(np.asarray(loss), np.asarray(ref), rtol=1e-5, atol=1e-6)
    print("KERNEL_OK")
</pallas_src>

<mosaic_0001>
module attributes {stable_mosaic.version = 11 : i64} {
  func.func @_dice_partial_kernel(%arg0: i32, %arg1: i32, %arg2: memref<2x8x256xf32, #tpu.memory_space<vmem>>, %arg3: memref<1x8x256xi32, #tpu.memory_space<vmem>>, %arg4: memref<1x1x8x128xf32, #tpu.memory_space<vmem>>) attributes {dimension_semantics = [#tpu.dimension_semantics<parallel>, #tpu.dimension_semantics<parallel>], iteration_bounds = array<i64: 2, 1>, scalar_prefetch = 0 : i64, scratch_operands = 0 : i64, tpu.core_type = #tpu.core_type<tc>, window_params = [{transform_indices = @transform_0, window_bounds = array<i64: 2, 8, 256>}, {transform_indices = @transform_1, window_bounds = array<i64: 1, 8, 256>}, {transform_indices = @transform_2, window_bounds = array<i64: 1, 1, 8, 128>}]} {
    %c0 = arith.constant 0 : index
    %c0_0 = arith.constant 0 : index
    %c0_1 = arith.constant 0 : index
    %0 = vector.load %arg3[%c0, %c0_0, %c0_1] : memref<1x8x256xi32, #tpu.memory_space<vmem>>, vector<1x8x256xi32>
    %1 = vector.shape_cast %0 : vector<1x8x256xi32> to vector<8x256xi32>
    %c0_2 = arith.constant 0 : index
    %c0_3 = arith.constant 0 : index
    %c0_4 = arith.constant 0 : index
    %2 = vector.load %arg2[%c0_2, %c0_3, %c0_4] : memref<2x8x256xf32, #tpu.memory_space<vmem>>, vector<1x8x256xf32>
    %3 = vector.shape_cast %2 : vector<1x8x256xf32> to vector<8x256xf32>
    %c0_i32 = arith.constant 0 : i32
    %4 = vector.broadcast %c0_i32 : i32 to vector<8x256xi32>
    %5 = arith.cmpi eq, %1, %4 : vector<8x256xi32>
    %cst = arith.constant 0.000000e+00 : f32
    %6 = vector.broadcast %cst : f32 to vector<8x256xf32>
    %7 = arith.select %5, %3, %6 : vector<8x256xi1>, vector<8x256xf32>
    %8 = vector.shape_cast %7 : vector<8x256xf32> to vector<1x8x256xf32>
    %cst_5 = arith.constant dense<0.000000e+00> : vector<1xf32>
    %9 = vector.multi_reduction <add>, %8, %cst_5 [1, 2] : vector<1x8x256xf32> to vector<1xf32>
    %10 = vector.shape_cast %9 : vector<1xf32> to vector<1x1x1xf32>
    %11 = vector.extract %10[0, 0, 0] : f32 from vector<1x1x1xf32>
    %cst_6 = arith.constant 0.000000e+00 : f32
    %12 = arith.addf %cst_6, %11 : f32
    %13 = vector.shape_cast %3 : vector<8x256xf32> to vector<1x8x256xf32>
    %cst_7 = arith.constant dense<0.000000e+00> : vector<1xf32>
    %14 = vector.multi_reduction <add>, %13, %cst_7 [1, 2] : vector<1x8x256xf32> to vector<1xf32>
    %15 = vector.shape_cast %14 : vector<1xf32> to vector<1x1x1xf32>
    %16 = vector.extract %15[0, 0, 0] : f32 from vector<1x1x1xf32>
    %cst_8 = arith.constant 0.000000e+00 : f32
    %17 = arith.addf %cst_8, %16 : f32
    %c1 = arith.constant 1 : index
    %c0_9 = arith.constant 0 : index
    %c0_10 = arith.constant 0 : index
    %18 = vector.load %arg2[%c1, %c0_9, %c0_10] : memref<2x8x256xf32, #tpu.memory_space<vmem>>, vector<1x8x256xf32>
    %19 = vector.shape_cast %18 : vector<1x8x256xf32> to vector<8x256xf32>
    %c1_i32 = arith.constant 1 : i32
    %20 = vector.broadcast %c1_i32 : i32 to vector<8x256xi32>
    %21 = arith.cmpi eq, %1, %20 : vector<8x256xi32>
    %cst_11 = arith.constant 0.000000e+00 : f32
    %22 = vector.broadcast %cst_11 : f32 to vector<8x256xf32>
    %23 = arith.select %21, %19, %22 : vector<8x256xi1>, vector<8x256xf32>
    %24 = vector.shape_cast %23 : vector<8x256xf32> to vector<1x8x256xf32>
    %cst_12 = arith.constant dense<0.000000e+00> : vector<1xf32>
    %25 = vector.multi_reduction <add>, %24, %cst_12 [1, 2] : vector<1x8x256xf32> to vector<1xf32>
    %26 = vector.shape_cast %25 : vector<1xf32> to vector<1x1x1xf32>
    %27 = vector.extract %26[0, 0, 0] : f32 from vector<1x1x1xf32>
    %28 = arith.addf %12, %27 : f32
    %29 = vector.shape_cast %19 : vector<8x256xf32> to vector<1x8x256xf32>
    %cst_13 = arith.constant dense<0.000000e+00> : vector<1xf32>
    %30 = vector.multi_reduction <add>, %29, %cst_13 [1, 2] : vector<1x8x256xf32> to vector<1xf32>
    %31 = vector.shape_cast %30 : vector<1xf32> to vector<1x1x1xf32>
    %32 = vector.extract %31[0, 0, 0] : f32 from vector<1x1x1xf32>
    %33 = arith.addf %17, %32 : f32
    %34 = tpu.iota {dimensions = array<i32: 1>} : vector<8x128xi32>
    %c0_i32_14 = arith.constant 0 : i32
    %35 = vector.broadcast %c0_i32_14 : i32 to vector<8x128xi32>
    %36 = arith.cmpi eq, %34, %35 : vector<8x128xi32>
    %c1_i32_15 = arith.constant 1 : i32
    %37 = vector.broadcast %c1_i32_15 : i32 to vector<8x128xi32>
    %38 = arith.cmpi eq, %34, %37 : vector<8x128xi32>
    %cst_16 = arith.constant 0.000000e+00 : f32
    %39 = vector.broadcast %33 : f32 to vector<8x128xf32>
    %40 = vector.broadcast %cst_16 : f32 to vector<8x128xf32>
    %41 = arith.select %38, %39, %40 : vector<8x128xi1>, vector<8x128xf32>
    %42 = vector.broadcast %28 : f32 to vector<8x128xf32>
    %43 = arith.select %36, %42, %41 : vector<8x128xi1>, vector<8x128xf32>
    %c0_17 = arith.constant 0 : index
    %c0_18 = arith.constant 0 : index
    %c0_19 = arith.constant 0 : index
    %c0_20 = arith.constant 0 : index
    %44 = vector.load %arg4[%c0_17, %c0_18, %c0_19, %c0_20] : memref<1x1x8x128xf32, #tpu.memory_space<vmem>>, vector<1x1x8x128xf32>
    %45 = vector.shape_cast %44 : vector<1x1x8x128xf32> to vector<8x128xf32>
    %46 = vector.shape_cast %43 : vector<8x128xf32> to vector<1x1x8x128xf32>
    tpu.vector_store %arg4[%c0_17, %c0_18, %c0_19, %c0_20], %46 {strides = array<i32>} : memref<1x1x8x128xf32, #tpu.memory_space<vmem>>, vector<1x1x8x128xf32>,
    return
  }
  func.func @transform_0(%arg0: i32, %arg1: i32) -> (i32, i32, i32) {
    %c0_i32 = arith.constant 0 : i32
    %c0_i32_0 = arith.constant 0 : i32
    return %arg0, %arg1, %c0_i32 : i32, i32, i32
  }
  func.func @transform_1(%arg0: i32, %arg1: i32) -> (i32, i32, i32) {
    %c0_i32 = arith.constant 0 : i32
    %c0_i32_0 = arith.constant 0 : i32
    return %arg0, %arg1, %c0_i32 : i32, i32, i32
  }
  func.func @transform_2(%arg0: i32, %arg1: i32) -> (i32, i32, i32, i32) {
    %c0_i32 = arith.constant 0 : i32
    %c0_i32_0 = arith.constant 0 : i32
    %c0_i32_1 = arith.constant 0 : i32
    return %arg0, %arg1, %c0_i32, %c0_i32_0 : i32, i32, i32, i32
  }
}

</mosaic_0001>

<bundles_post_ra>
// kernel: tpu_custom_call.1
= control target key start
LH: loop header
LB: loop body
LE: loop exit
PB: predicated region body
PF: predicated region fallthrough
CT: control target
= control target key end

     0   :  { %7 = vsyncpa [#allocation3], 0  ;;  %s847_s0 = inlined_call_operand.hbm [shape: f32[4,8,256], index: 0, kind: input, shape index: {}]   ;;  %s848_s1 = inlined_call_operand.hbm [shape: s32[2,8,256], index: 1, kind: input, shape index: {}]   ;;  %s849_s2 = inlined_call_operand.hbm [shape: f32[2,1,8,128], index: 2, kind: output, shape index: {}]  }
   0x1   :  { %9 = vsyncpa [#allocation3 + $0x1], 0 }
   0x2   :  { %10 = vsyncpa [#allocation6], 0 }
   0x3   :  { %12 = vsyncpa [#allocation6 + $0x1], 0 }
   0x4   :  { %13 = vsyncpa [#allocation4], 0 }
   0x5   :  { %15 = vsyncpa [#allocation4 + $0x1], 0  ;;  %s678_s9 = smov 0   ;;  %s680_s10 = smov 0  }
   0x6   :  { %s682_s11 = smov 0   ;;  %s684_s12 = smov 0  }
   0x7   :  { %s686_s13 = smov 0   ;;  %s688_s14 = smov 0  }
   0x8 LB: > { %s415_s15 = sadd.s32 4294967295, %s656_s14   ;;  %s416_s16 = sadd.s32 4294967294, %s656_s14   ;;  %s656_s14 = sphi %s688_s14, %s21_s14   ;;  %s652_s13 = sphi %s686_s13, %s860_s13   ;;  %s648_s12 = sphi %s684_s12, %s859_s12   ;;  %s644_s11 = sphi %s682_s11, %s858_s11   ;;  %s640_s10 = sphi %s680_s10, %s857_s10   ;;  %s636_s9 = sphi %s678_s9, %s856_s9  }
   0x9   : > { %s33_s17 = sadd.s32 1, %s652_s13  ;;  %s42_s18 = sadd.s32 1, %s644_s11 }
   0xa   : > { %p35_p0 = scmp.ge.s32.totalorder %s33_s17, 2  ;;  %p49_p1 = scmp.ne.s32.totalorder %s644_s11, %s640_s10 }
   0xb   : > { %p50_p2 = scmp.eq.s32.totalorder %s656_s14, 0  ;;  %p55_p3 = scmp.ne.s32.totalorder %s640_s10, %s636_s9 }
   0xc   : > { %s862_s17 = smov (%p35_p0, %s33_s17), 0  ;;  %p56_p5 = scmp.eq.s32.totalorder %s415_s15, 0 }
   0xd   : > { %p719_p4 = por %p50_p2, %p49_p1  ;;  %s37_s20 = ssub.s32 %s652_s13, %s862_s17 }
   0xe   : > { %p109_p6 = scmp.eq.s32.totalorder %s415_s15, 1  ;;  %p40_p7 = scmp.eq.s32.totalorder %s37_s20, 0 }
   0xf   : > { %p725_p8 = por %p56_p5, %p55_p3  ;;  %p115_p10 = scmp.eq.s32.totalorder %s416_s16, 1 }
  0x10   : > { %p729_p9 = por %p109_p6, %p49_p1  ;;  %p418_p12 = scmp.ge.s32.totalorder %s656_s14, 2 }
  0x11   : > { %s734_s23 = scalar_select %p40_p7, %s644_s11, %s42_s18  }
  0x12   : > { %p736_p11 = por %p115_p10, %p55_p3  ;;  %p464_p13 = scmp.lt.s32.totalorder %s656_s14, 2 }
  0x13   : > { %s743_s25 = sand.u32 1, %s644_s11   ;;  %s437_s27 = sshll.u32 %s652_s13, 9 }
  0x14   : > { %s419_s26 = sshll.u32 %s743_s25, 5  ;;  %s148_s30 = scalar_lea.hbm %s847_s0, %s437_s27 }
  0x15   : > { %s139_s3 = scalar_lea.vmem [#allocation2], %s419_s26  ;;  %p752_p0 = pnand %p464_p13, %p719_p4 }
  0x16   : > { %s149_s4 = sshll.u32 %s139_s3, 4  ;;  %p426_p1 = scmp.ge.s32.totalorder %s656_s14, 1  ;;  %s150_s4 = int_to_ptr.vmem [resolvable:$true] %s149_s4 }
  0x17   : > { %s136_s6 = scalar_lea.sflag [#allocation3], %s743_s25  ;;  %p518_p2 = pneg %p752_p0 }
  0x18   : > { %s529_s7 = scalar_lea.vmem %s150_s4, 512  ;;  %s658_s8 = smov [#allocation2]  }
  0x19   : > { %p530_p3 = scmp.ne.s32.totalorder %s150_s4, %s529_s7  ;;  %s534_s15 = sshll.u32 %s658_s8, 4  ;;  %s535_s15 = int_to_ptr.vmem [resolvable:$false] %s534_s15 }
  0x1a   : > { %s536_s16 = scalar_lea.vmem %s535_s15, 1024  ;;  %p537_p4 = scmp.lt.s32.totalorder %s150_s4, %s535_s15 }
  0x1b   : > { %p532_p5 = pnand %p530_p3, %p518_p2  ;;  %p538_p7 = scmp.lt.s32.totalorder %s536_s16, %s529_s7 }
  0x1d   : > { %p533_p6 = pneg %p532_p5  ;;  %p539_p10 = por %p538_p7, %p537_p4 }
  0x1f   : > { %p540_p13 = pnand %p539_p10, %p533_p6 }
  0x21   : > { %543 = shalt.err (!%p540_p13)
}
  0x22   : > { %s659_s18 = smov 256   ;;  %s660_s19 = smov 16  }
  0x23   : > { %456 = dma.hbm_to_vmem [thread:$0]  (!%p752_p0), %s148_s30, 512, %s150_s4, %s136_s6, %s659_s18, %s659_s18, %s660_s19  }
  0x24   : > { %p178_p3 = scmp.lt.s32.totalorder %s656_s14, 3  ;;  %s423_s20 = sshll.u32 %s743_s25, 4 }
  0x25   : > { %s438_s26 = sshll.u32 %s652_s13, 8  ;;  %s163_s7 = scalar_lea.vmem [#allocation5], %s423_s20 }
  0x26   : > { %p770_p5 = pnand %p426_p1, %p178_p3  ;;  %s171_s3 = scalar_lea.hbm %s848_s1, %s438_s26 }
  0x27   : > { %s173_s8 = sshll.u32 %s163_s7, 4  ;;  %s160_s15 = scalar_lea.sflag [#allocation6], %s743_s25  ;;  %s174_s8 = int_to_ptr.vmem [resolvable:$true] %s173_s8 }
  0x28   : > { %s557_s16 = scalar_lea.vmem %s174_s8, 256  ;;  %s661_s30 = smov [#allocation5]  }
  0x29   : > { %p558_p6 = scmp.ne.s32.totalorder %s174_s8, %s557_s16  ;;  %s562_s4 = sshll.u32 %s661_s30, 4  ;;  %s563_s4 = int_to_ptr.vmem [resolvable:$false] %s562_s4 }
  0x2a   : > { %s564_s6 = scalar_lea.vmem %s563_s4, 512  ;;  %p565_p1 = scmp.lt.s32.totalorder %s174_s8, %s563_s4 }
  0x2b   : > { %p560_p4 = pnand %p558_p6, %p518_p2  ;;  %p566_p10 = scmp.lt.s32.totalorder %s564_s6, %s557_s16 }
  0x2d   : > { %p561_p7 = pneg %p560_p4  ;;  %p567_p13 = por %p566_p10, %p565_p1 }
  0x2f   : > { %p568_p3 = pnand %p567_p13, %p561_p7 }
  0x31   : > { %571 = shalt.err (!%p568_p3)
}
  0x32   : > { %459 = dma.hbm_to_vmem [thread:$0]  (!%p752_p0), %s171_s3, 256, %s174_s8, %s160_s15  }
  0x33   : > { %182 = sbr.rel (%p770_p5) target bundleno = 290 (0x122), region = 28  ;;  %s786_s25 = sand.u32 (!%p770_p5), 1, %s640_s10  }
  0x34   : > { %s427_s18 = sshll.u32 (!%p770_p5), %s786_s25, 5  ;;  %s185_s19 = scalar_lea.sflag (!%p770_p5), [#allocation3], %s786_s25 }
  0x35   : > { %s188_s20 = scalar_lea.vmem (!%p770_p5), [#allocation2], %s427_s18 }
  0x38   : > { %623 = dma.done.wait (%p725_p8), %s185_s19, 512  }
  0x39   : > { %625 = vsyncadd (%p725_p8), %s185_s19, 4294966784  ;;  %s428_s5 = sshll.u32 %s786_s25, 4  ;;  %s194_s26 = scalar_lea.sflag [#allocation6], %s786_s25 }
  0x3a   : > { %s197_s27 = scalar_lea.vmem [#allocation5], %s428_s5 }
  0x3b   : > { %627 = dma.done.wait (%p725_p8), %s194_s26, 256  }
  0x3c   : > { %629 = vsyncadd (%p725_p8), %s194_s26, 4294967040  ;;  %v224_v0 = vld [vmem:[%s197_s27] sm:$0xff]  ;;  %v225_v1 = vld [vmem:[%s197_s27 + $0x8] sm:$0xff]  ;;  %v283_v42 = vlaneseq  ;;  %s429_s21 = sshll.u32 %s786_s25, 3  ;;  %s433_s7 = sshll.u32 %s648_s12, 7 }
  0x3d   : > { %v430_v2 = vld [vmem:[%s188_s20 + $0x10] sm:$0xff]  ;;  %v431_v3 = vld [vmem:[%s188_s20 + $0x18] sm:$0xff]  ;;  %vm257_vm0 = vcmp.eq.s32.totalorder %v224_v0, 1  ;;  %vm258_vm1 = vcmp.eq.s32.totalorder %v225_v1, 1  ;;  %v226_v4 = vld [vmem:[%s188_s20] sm:$0xff]  ;;  %vm228_vm2 = vcmp.eq.s32.totalorder %v224_v0, 0  ;;  %s805_s19 = scalar_lea.hbm %s849_s2, %s433_s7 }
  0x3e   : > { %v227_v5 = vld [vmem:[%s188_s20 + $0x8] sm:$0xff]  ;;  %v259_v6 = vsel %vm257_vm0, %v430_v2, 0.0  ;;  %v260_v7 = vsel %vm258_vm1, %v431_v3, 0.0  ;;  %vm229_vm3 = vcmp.eq.s32.totalorder %v225_v1, 0  ;;  %v230_v8 = vsel %vm228_vm2, %v226_v4, 0.0  ;;  %s222_s30 = scalar_lea.vmem [#allocation7], %s429_s21 }
  0x3f   : > { %v261_v9 = vadd.f32 %v260_v7, %v259_v6  ;;  %v231_v10 = vsel %vm229_vm3, %v227_v5, 0.0  ;;  %v272_v12 = vadd.f32 %v431_v3, %v430_v2  ;;  %v243_v13 = vadd.f32 %v227_v5, %v226_v4  ;;  %s307_s4 = sshll.u32 %s222_s30, 4  ;;  %s293_s12 = scalar_lea.sflag [#allocation4], %s786_s25  ;;  %s308_s4 = int_to_ptr.vmem [resolvable:$true] %s307_s4 }
  0x40   : > { %v232_v11 = vadd.f32 %v231_v10, %v230_v8  ;;  %v284_v43 = vand.u32 127, %v283_v42  ;;  %s572_s20 = scalar_lea.vmem %s308_s4, 128  ;;  %s662_s5 = smov [#allocation7]  }
  0x41   : > { %262 = vadd.xlane.f32.xlu1 %v261_v9  ;;  %p573_p8 = scmp.ne.s32.totalorder %s308_s4, %s572_s20  ;;  %s576_s26 = sshll.u32 %s662_s5, 4  ;;  %s577_s26 = int_to_ptr.vmem [resolvable:$false] %s576_s26 }
  0x42   : > { %233 = vadd.xlane.f32.xlu0 %v232_v11  ;;  %vm286_vm4 = vcmp.eq.s32.totalorder %v284_v43, 1  ;;  %vm285_vm5 = vcmp.eq.s32.totalorder %v284_v43, 0  ;;  %s578_s27 = scalar_lea.vmem %s577_s26, 256  ;;  %p579_p5 = scmp.lt.s32.totalorder %s308_s4, %s577_s26 }
  0x43   : > { %p574_p0 = pnand %p573_p8, %p729_p9  ;;  %p580_p6 = scmp.lt.s32.totalorder %s578_s27, %s572_s20 }
  0x45   : > { %273 = vadd.xlane.f32.xlu1 %v272_v12  ;;  %p575_p2 = pneg %p574_p0  ;;  %p581_p4 = por %p580_p6, %p579_p5 }
  0x46   : > { %244 = vadd.xlane.f32.xlu0 %v243_v13 }
  0x47   : > { %p582_p7 = pnand %p581_p4, %p575_p2 }
  0xca   : > { %v263_v14 = vpop.xlane.xlu1 %262 }
  0xcb   : > { %v264_v15 = vrot.slane %v263_v14, 4  ;;  %v234_v16 = vpop.xlane.xlu0 %233 }
  0xcc   : > { %v235_v17 = vrot.slane %v234_v16, 4 }
  0xcd   : > { %v265_v18 = vadd.f32 %v264_v15, %v263_v14 }
  0xce   : > { %v236_v19 = vadd.f32 %v235_v17, %v234_v16  ;;  %v274_v20 = vpop.xlane.xlu1 %273 }
  0xcf   : > { %v266_v21 = vrot.slane %v265_v18, 2  ;;  %v275_v22 = vrot.slane %v274_v20, 4  ;;  %v245_v23 = vpop.xlane.xlu0 %244 }
  0xd0   : > { %v237_v24 = vrot.slane %v236_v19, 2  ;;  %v246_v25 = vrot.slane %v245_v23, 4 }
  0xd1   : > { %v276_v26 = vadd.f32 %v275_v22, %v274_v20  ;;  %v267_v30 = vadd.f32 %v266_v21, %v265_v18 }
  0xd2   : > { %v247_v27 = vadd.f32 %v246_v25, %v245_v23  ;;  %v238_v28 = vadd.f32 %v237_v24, %v236_v19 }
  0xd3   : > { %v277_v29 = vrot.slane %v276_v26, 2  ;;  %v268_v36 = vrot.slane %v267_v30, 1 }
  0xd4   : > { %v248_v31 = vrot.slane %v247_v27, 2  ;;  %v239_v32 = vrot.slane %v238_v28, 1 }
  0xd5   : > { %v278_v33 = vadd.f32 %v277_v29, %v276_v26  ;;  %v269_v41 = vadd.f32 %v268_v36, %v267_v30 }
  0xd6   : > { %v249_v34 = vadd.f32 %v248_v31, %v247_v27  ;;  %v240_v35 = vadd.f32 %v239_v32, %v238_v28 }
  0xd7   : > { %v279_v37 = vrot.slane %v278_v33, 1 }
  0xd8   : > { %439 = vpush %v240_v35  ;;  %v250_v38 = vrot.slane %v249_v34, 1 }
  0xd9   : > { %v280_v40 = vadd.f32 %v279_v37, %v278_v33 }
  0xda   : > { %v251_v39 = vadd.f32 %v250_v38, %v249_v34 }
  0xdc   : > { %441 = vpush %v251_v39 }
  0xdd   : > { %443 = vpush %v269_v41 }
  0xde   : > { %445 = vpush %v280_v40 }
 0x109   : > { %s440_s28 = spop %439 }
 0x10d   : > { %s442_s29 = spop %441 }
 0x10e   : > { %s444_s3 = spop %443 }
 0x10f   : > { %s271_s8 = sadd.f32 %s444_s3, %s440_s28  ;;  %s446_s15 = spop %445 }
 0x110   : > { %s282_s16 = sadd.f32 %s446_s15, %s442_s29 }
 0x111   : > { %v289_v44 = vstv %s271_s8 }
 0x112   : > { %v287_v45 = vstv %s282_s16 }
 0x113   : > { %v288_v46 = vsel %vm286_vm4, %v287_v45, 0.0 }
 0x114   : > { %v290_v47 = vsel %vm285_vm5, %v289_v44, %v288_v46 }
 0x115   : > { %291 = vst [vmem:[%s222_s30] sm:$0xff] %v290_v47 }
 0x116   : > { %585 = shalt.err (!%p582_p7)
}
 0x117   : > { %s586_s21 = scalar_lea.hbm %s805_s19, 128  ;;  %s590_s29 = scalar_lea.hbm %s849_s2, 256 }
 0x118   : > { %p587_p1 = scmp.ne.s32.totalorder %s805_s19, %s586_s21  ;;  %p591_p3 = scmp.lt.s32.totalorder %s805_s19, %s849_s2 }
 0x119   : > { %p592_p8 = scmp.lt.s32.totalorder %s590_s29, %s586_s21 }
 0x11a   : > { %p588_p10 = pnand %p587_p1, %p729_p9 }
 0x11b   : > { %p593_p0 = por %p592_p8, %p591_p3 }
 0x11c   : > { %p589_p13 = pneg %p588_p10 }
 0x11e   : > { %p594_p2 = pnand %p593_p0, %p589_p13 }
 0x120   : > { %597 = shalt.err (!%p594_p2)
}
 0x121   : > { %451 = dma.vmem_to_hbm [thread:$0]  (%p729_p9), %s308_s4, 128, %s805_s19, %s293_s12  }
 0x122 PF: > { %s319_s8 = sand.u32 1, %s636_s9   ;;  %p461_p5 = pnand %p418_p12, %p736_p11 }
 0x123   : > { %s320_s15 = scalar_lea.sflag [#allocation4], %s319_s8 }
 0x124   : > { %p462_p6 = pneg %p461_p5 }
 0x126   : > { %631 = dma.done.wait (%p462_p6), %s320_s15, 128  }
 0x127   : > { %633 = vsyncadd (%p462_p6), %s320_s15, 4294967168  ;;  %s21_s14 = sadd.s32 1, %s656_s14   ;;  %s856_s9 = smov %s640_s10 }
 0x128   : > { %p18_p4 = scmp.ge.s32.totalorder %s21_s14, 4   ;;  %s857_s10 = smov %s644_s11 }
 0x129   : > { %s858_s11 = smov %s734_s23  ;;  %s859_s12 = smov %s652_s13 }
 0x12a   : > { %s860_s13 = smov %s862_s17  ;;  %20 = sbr.rel (!%p18_p4) target bundleno = 8 (0x8), region = 87 }
 0x12f   :  { %325 = vsyncpa [#allocation3], 1 }
 0x130   :  { %327 = vsyncpa [#allocation3 + $0x1], 1 }
 0x131   :  { %328 = vsyncpa [#allocation6], 1 }
 0x132   :  { %330 = vsyncpa [#allocation6 + $0x1], 1 }
 0x133   :  { %331 = vsyncpa [#allocation4], 1 }
 0x134   :  { %333 = vsyncpa [#allocation4 + $0x1], 1 }

</bundles_post_ra>
